<compile_context>
chip_gen: v5e
topology: v5e:2x2
jax: 0.10.0
libtpu: 0.0.40
codegen_flags: <defaults>
</compile_context>

<pallas_src>
import functools

import jax
import jax.numpy as jnp
from jax.experimental import pallas as pl
from jax.experimental.pallas import tpu as pltpu


def _corr_band_kernel(x0p_ref, x1_ref, out_ref, *, W, TM, inv_c):
    # x0p_ref: (1, CT + 2*hw, C)  padded x0, resident for this batch element
    # x1_ref : (1, TM, C)         current CT tile of x1
    # out_ref: (1, W, TM)         lane-dense band output for this tile
    t = pl.program_id(1)
    base = t * TM                      # first (unpadded) row of this tile
    x1 = x1_ref[0]                     # (TM, C)

    bands = []
    for j in range(W):                 # W is tiny & static -> unrolled
        # Neighbor j of global row i lives at padded row i + j.
        win = x0p_ref[0, pl.ds(base + j, TM), :]       # (TM, C)
        prod = (x1 * win)[None]                        # (1, TM, C)
        bands.append(jnp.sum(prod, axis=-1))           # (1, TM)

    out = bands[0] if W == 1 else jnp.concatenate(bands, axis=0)  # (W, TM)
    out_ref[0] = (out * inv_c).astype(out_ref.dtype)


def _pick_ct_tile(CT):
    # Tile CT only when it splits into lane-aligned tiles; otherwise process
    # the full cutout dim in one block (a partial tile must equal the full
    # dim per the (8, 128) block-shape rule).
    for tm in (512, 256, 128):
        if CT % tm == 0:
            return tm
    return CT


def correlation_net_forward(x0, x1, *, window_size, panoramatic_scan):
    """Pallas equivalent of _CorrelationNet.forward.

    Args:
      x0: [B, CT, C] feature embedding for the previous scan.
      x1: [B, CT, C] feature embedding for the current scan.
    Returns:
      [B, CT, W] float32 banded correlation, W = 2*(window_size//2) + 1.
    """
    B, CT, C = x0.shape
    hw = int(window_size / 2)
    W = 2 * hw + 1

    # Bake wrap / clamp neighbor indexing into an hw-row pad of x0 so that
    # idx(i, j) = i + j in padded coordinates (always in bounds).
    if hw > 0:
        if panoramatic_scan:
            left = x0[:, CT - hw:, :]
            right = x0[:, :hw, :]
        else:
            left = jnp.broadcast_to(x0[:, :1, :], (B, hw, C))
            right = jnp.broadcast_to(x0[:, CT - 1:, :], (B, hw, C))
        x0p = jnp.concatenate([left, x0, right], axis=1)
    else:
        x0p = x0
    CTP = CT + 2 * hw

    TM = _pick_ct_tile(CT)
    num_t = CT // TM

    kernel = functools.partial(
        _corr_band_kernel, W=W, TM=TM, inv_c=1.0 / float(C))

    out_wct = pl.pallas_call(
        kernel,
        out_shape=jax.ShapeDtypeStruct((B, W, CT), jnp.float32),
        grid=(B, num_t),
        in_specs=[
            # Padded x0: full block per batch element, resident across the
            # CT-tile axis (index map ignores t -> no refetch between tiles).
            pl.BlockSpec((1, CTP, C), lambda b, t: (b, 0, 0)),
            # x1: tiled along CT.
            pl.BlockSpec((1, TM, C), lambda b, t: (b, t, 0)),
        ],
        # Lane-dense output: W rows of TM lanes each.
        out_specs=pl.BlockSpec((1, W, TM), lambda b, t: (b, 0, t)),
        compiler_params=pltpu.CompilerParams(
            dimension_semantics=("parallel", "parallel")),
    )(x0p, x1)

    # [B, W, CT] -> [B, CT, W] to match the PyTorch module's output layout.
    return jnp.transpose(out_wct, (0, 2, 1))


def _reference_forward(x0, x1, *, window_size, panoramatic_scan):
    """Pure-JAX reference mirroring the PyTorch module semantics."""
    B, CT, C = x0.shape
    hw = int(window_size / 2)
    window_inds = jnp.arange(-hw, hw + 1)
    inds = jnp.arange(CT)[:, None] + window_inds[None, :]
    if panoramatic_scan:
        inds = jnp.mod(inds, CT)
    else:
        inds = jnp.clip(inds, 0, CT - 1)
    inds = jnp.broadcast_to(inds[None], (B, CT, inds.shape[1]))
    corr = jnp.einsum("bic,bjc->bij", x1, x0) / float(C)
    return jnp.take_along_axis(corr, inds, axis=2)


if __name__ == "__main__":
    # Small deterministic example consistent with the module's forward():
    # x0, x1: [B, CT, C]
    B, CT, C = 2, 16, 32
    window_size = 4            # -> hw = 2, W = 5

    key = jax.random.PRNGKey(0)
    k0, k1 = jax.random.split(key)
    x0 = jax.random.normal(k0, (B, CT, C), dtype=jnp.float32)
    x1 = jax.random.normal(k1, (B, CT, C), dtype=jnp.float32)

    W = 2 * int(window_size / 2) + 1
    for pano in (True, False):   # exercise both the wrap and clamp paths
        out = correlation_net_forward(
            x0, x1, window_size=window_size, panoramatic_scan=pano)
        out = jax.block_until_ready(out)

        ref = _reference_forward(
            x0, x1, window_size=window_size, panoramatic_scan=pano)
        ref = jax.block_until_ready(ref)

        assert out.shape == (B, CT, W), out.shape
        assert jnp.allclose(out, ref, atol=1e-5, rtol=1e-5), (
            pano, float(jnp.max(jnp.abs(out - ref))))

    print("KERNEL_OK")
</pallas_src>

<mosaic_0001>
module attributes {stable_mosaic.version = 11 : i64} {
  func.func @_corr_band_kernel(%arg0: i32, %arg1: i32, %arg2: memref<1x20x32xf32, #tpu.memory_space<vmem>>, %arg3: memref<1x16x32xf32, #tpu.memory_space<vmem>>, %arg4: memref<1x5x16xf32, #tpu.memory_space<vmem>>) attributes {dimension_semantics = [#tpu.dimension_semantics<parallel>, #tpu.dimension_semantics<parallel>], iteration_bounds = array<i64: 2, 1>, scalar_prefetch = 0 : i64, scratch_operands = 0 : i64, tpu.core_type = #tpu.core_type<tc>, window_params = [{transform_indices = @transform_0, window_bounds = array<i64: 1, 20, 32>}, {transform_indices = @transform_1, window_bounds = array<i64: 1, 16, 32>}, {transform_indices = @transform_2, window_bounds = array<i64: 1, 5, 16>}]} {
    %c16_i32 = arith.constant 16 : i32
    %0 = arith.muli %arg1, %c16_i32 : i32
    %c0 = arith.constant 0 : index
    %c0_0 = arith.constant 0 : index
    %c0_1 = arith.constant 0 : index
    %1 = vector.load %arg3[%c0, %c0_0, %c0_1] : memref<1x16x32xf32, #tpu.memory_space<vmem>>, vector<1x16x32xf32>
    %2 = vector.shape_cast %1 : vector<1x16x32xf32> to vector<16x32xf32>
    %c0_i32 = arith.constant 0 : i32
    %3 = arith.addi %0, %c0_i32 : i32
    %c0_2 = arith.constant 0 : index
    %4 = arith.index_cast %3 : i32 to index
    %c0_3 = arith.constant 0 : index
    %5 = vector.load %arg2[%c0_2, %4, %c0_3] : memref<1x20x32xf32, #tpu.memory_space<vmem>>, vector<1x16x32xf32>
    %6 = vector.shape_cast %5 : vector<1x16x32xf32> to vector<16x32xf32>
    %7 = arith.mulf %2, %6 : vector<16x32xf32>
    %8 = vector.shape_cast %7 : vector<16x32xf32> to vector<1x16x32xf32>
    %cst = arith.constant dense<0.000000e+00> : vector<1x16xf32>
    %9 = vector.multi_reduction <add>, %8, %cst [2] : vector<1x16x32xf32> to vector<1x16xf32>
    %c1_i32 = arith.constant 1 : i32
    %10 = arith.addi %0, %c1_i32 : i32
    %c0_4 = arith.constant 0 : index
    %11 = arith.index_cast %10 : i32 to index
    %c0_5 = arith.constant 0 : index
    %12 = vector.load %arg2[%c0_4, %11, %c0_5] : memref<1x20x32xf32, #tpu.memory_space<vmem>>, vector<1x16x32xf32>
    %13 = vector.shape_cast %12 : vector<1x16x32xf32> to vector<16x32xf32>
    %14 = arith.mulf %2, %13 : vector<16x32xf32>
    %15 = vector.shape_cast %14 : vector<16x32xf32> to vector<1x16x32xf32>
    %cst_6 = arith.constant dense<0.000000e+00> : vector<1x16xf32>
    %16 = vector.multi_reduction <add>, %15, %cst_6 [2] : vector<1x16x32xf32> to vector<1x16xf32>
    %c2_i32 = arith.constant 2 : i32
    %17 = arith.addi %0, %c2_i32 : i32
    %c0_7 = arith.constant 0 : index
    %18 = arith.index_cast %17 : i32 to index
    %c0_8 = arith.constant 0 : index
    %19 = vector.load %arg2[%c0_7, %18, %c0_8] : memref<1x20x32xf32, #tpu.memory_space<vmem>>, vector<1x16x32xf32>
    %20 = vector.shape_cast %19 : vector<1x16x32xf32> to vector<16x32xf32>
    %21 = arith.mulf %2, %20 : vector<16x32xf32>
    %22 = vector.shape_cast %21 : vector<16x32xf32> to vector<1x16x32xf32>
    %cst_9 = arith.constant dense<0.000000e+00> : vector<1x16xf32>
    %23 = vector.multi_reduction <add>, %22, %cst_9 [2] : vector<1x16x32xf32> to vector<1x16xf32>
    %c3_i32 = arith.constant 3 : i32
    %24 = arith.addi %0, %c3_i32 : i32
    %c0_10 = arith.constant 0 : index
    %25 = arith.index_cast %24 : i32 to index
    %c0_11 = arith.constant 0 : index
    %26 = vector.load %arg2[%c0_10, %25, %c0_11] : memref<1x20x32xf32, #tpu.memory_space<vmem>>, vector<1x16x32xf32>
    %27 = vector.shape_cast %26 : vector<1x16x32xf32> to vector<16x32xf32>
    %28 = arith.mulf %2, %27 : vector<16x32xf32>
    %29 = vector.shape_cast %28 : vector<16x32xf32> to vector<1x16x32xf32>
    %cst_12 = arith.constant dense<0.000000e+00> : vector<1x16xf32>
    %30 = vector.multi_reduction <add>, %29, %cst_12 [2] : vector<1x16x32xf32> to vector<1x16xf32>
    %c4_i32 = arith.constant 4 : i32
    %31 = arith.addi %0, %c4_i32 : i32
    %c0_13 = arith.constant 0 : index
    %32 = arith.index_cast %31 : i32 to index
    %c0_14 = arith.constant 0 : index
    %33 = vector.load %arg2[%c0_13, %32, %c0_14] : memref<1x20x32xf32, #tpu.memory_space<vmem>>, vector<1x16x32xf32>
    %34 = vector.shape_cast %33 : vector<1x16x32xf32> to vector<16x32xf32>
    %35 = arith.mulf %2, %34 : vector<16x32xf32>
    %36 = vector.shape_cast %35 : vector<16x32xf32> to vector<1x16x32xf32>
    %cst_15 = arith.constant dense<0.000000e+00> : vector<1x16xf32>
    %37 = vector.multi_reduction <add>, %36, %cst_15 [2] : vector<1x16x32xf32> to vector<1x16xf32>
    %38 = tpu.concatenate %9, %16, %23, %30, %37 in 0 : vector<1x16xf32>, vector<1x16xf32>, vector<1x16xf32>, vector<1x16xf32>, vector<1x16xf32> -> vector<5x16xf32>
    %cst_16 = arith.constant 3.125000e-02 : f32
    %39 = vector.broadcast %cst_16 : f32 to vector<5x16xf32>
    %40 = arith.mulf %38, %39 : vector<5x16xf32>
    %c0_17 = arith.constant 0 : index
    %c0_18 = arith.constant 0 : index
    %c0_19 = arith.constant 0 : index
    %41 = vector.load %arg4[%c0_17, %c0_18, %c0_19] : memref<1x5x16xf32, #tpu.memory_space<vmem>>, vector<1x5x16xf32>
    %42 = vector.shape_cast %41 : vector<1x5x16xf32> to vector<5x16xf32>
    %43 = vector.shape_cast %40 : vector<5x16xf32> to vector<1x5x16xf32>
    tpu.vector_store %arg4[%c0_17, %c0_18, %c0_19], %43 {strides = array<i32>} : memref<1x5x16xf32, #tpu.memory_space<vmem>>, vector<1x5x16xf32>,
    return
  }
  func.func @transform_0(%arg0: i32, %arg1: i32) -> (i32, i32, i32) {
    %c0_i32 = arith.constant 0 : i32
    %c0_i32_0 = arith.constant 0 : i32
    %c0_i32_1 = arith.constant 0 : i32
    return %arg0, %c0_i32, %c0_i32_0 : i32, i32, i32
  }
  func.func @transform_1(%arg0: i32, %arg1: i32) -> (i32, i32, i32) {
    %c0_i32 = arith.constant 0 : i32
    %c0_i32_0 = arith.constant 0 : i32
    return %arg0, %arg1, %c0_i32 : i32, i32, i32
  }
  func.func @transform_2(%arg0: i32, %arg1: i32) -> (i32, i32, i32) {
    %c0_i32 = arith.constant 0 : i32
    %c0_i32_0 = arith.constant 0 : i32
    return %arg0, %c0_i32, %arg1 : i32, i32, i32
  }
}

</mosaic_0001>

<bundles_post_ra>
// kernel: tpu_custom_call.1
= control target key start
LH: loop header
LB: loop body
LE: loop exit
PB: predicated region body
PF: predicated region fallthrough
CT: control target
= control target key end

     0   :  { %s493_s9 = smov 0   ;;  %s495_s10 = smov 0   ;;  %s561_s0 = inlined_call_operand.vmem [shape: f32[2,20,32], index: 0, kind: input, shape index: {}]   ;;  %s562_s1 = inlined_call_operand.vmem [shape: f32[2,16,32], index: 1, kind: input, shape index: {}]   ;;  %s563_s2 = inlined_call_operand.vmem [shape: f32[2,5,16], index: 2, kind: output, shape index: {}]  }
   0x1   :  { %s497_s11 = smov 0  }
   0x2 LB: > { %s24_s12 = sadd.s32 1, %s472_s10  ;;  %p413_p0 = scmp.ge.s32.totalorder %s476_s11, 1  ;;  %s476_s11 = sphi %s497_s11, %s12_s11   ;;  %s472_s10 = sphi %s495_s10, %s565_s10   ;;  %s468_s9 = sphi %s493_s9, %s564_s9  }
   0x3   : > { %p26_p1 = scmp.ge.s32.totalorder %s24_s12, 2  ;;  %p143_p2 = scmp.lt.s32.totalorder %s476_s11, 3 }
   0x5   : > { %s567_s12 = smov (%p26_p1, %s24_s12), 0  ;;  %p144_p3 = pnand %p413_p0, %p143_p2 }
   0x6   : > { %p176_p4 = scmp.lt.s32.totalorder (!%p144_p3), %s468_s9, 1 }
   0x7   : > { %147 = sbr.rel (%p144_p3) target bundleno = 169 (0xa9), region = 28 }
   0xc   : > { %s569_s9 = smov (!%p176_p4, %s468_s9), 1  ;;  %vm206_vm0 = vcmask 261120   ;;  %v263_v35 = vlaneseq  ;;  %vm268_vm1 = vcmask 130112   ;;  %vm295_vm2 = vcmask 1040384  }
   0xd   : > { %s429_s13 = smul.u32 24, %s569_s9  ;;  %s428_s14 = sshll.u32 %s569_s9, 4  ;;  %vm297_vm3 = vcmask 1041408   ;;  %vm299_vm4 = vcmask 1042432   ;;  %vm301_vm5 = vcmask 1043456   ;;  %vm304_vm6 = vcmask 126976  }
   0xe   : > { %s189_s17 = scalar_lea.vmem %s562_s1, %s428_s14  ;;  %v264_v38 = vand.u32 127, %v263_v35  ;;  %s417_s21 = sshll.u32 %s569_s9, 3 }
   0xf   : > { %s521_s20 = scalar_lea.vmem %s561_s0, %s429_s13  ;;  %v199_v0 = vld [vmem:[%s189_s17] sm:$0xff]  ;;  %v200_v7 = vld [vmem:[%s189_s17 + $0x8] sm:$0xff]  ;;  %s197_s24 = scalar_lea.vmem %s563_s2, %s417_s21 }
  0x10   : > { %v420_v1 = vld [vmem:[%s521_s20 + $0x2] sm:$0xff]  ;;  %v421_v8 = vld [vmem:[%s521_s20 + $0xa] sm:$0xff]  ;;  %v266_v39 = vadd.s32 4294967288, %v264_v38 }
  0x11   : > { %v418_v2 = vld [vmem:[%s521_s20 + $0x1] sm:$0xff]  ;;  %v229_v4 = vmul.f32 %v420_v1, %v199_v0  ;;  %v419_v9 = vld [vmem:[%s521_s20 + $0x9] sm:$0xff]  ;;  %v230_v14 = vmul.f32 %v421_v8, %v200_v7 }
  0x12   : > { %v202_v3 = vld [vmem:[%s521_s20] sm:$0xff]  ;;  %v217_v5 = vmul.f32 %v418_v2, %v199_v0  ;;  %v203_v13 = vld [vmem:[%s521_s20 + $0x8] sm:$0xff]  ;;  %v218_v15 = vmul.f32 %v419_v9, %v200_v7 }
  0x13   : > { %v204_v6 = vmul.f32 %v202_v3, %v199_v0  ;;  %v231_v10 = vsel %vm206_vm0, %v229_v4, 0.0  ;;  %v205_v16 = vmul.f32 %v203_v13, %v200_v7  ;;  %v234_v17 = vsel %vm206_vm0, %v230_v14, 0.0  ;;  %v423_v20 = vld [vmem:[%s521_s20 + $0xb] sm:$0xff]  ;;  %v422_v22 = vld [vmem:[%s521_s20 + $0x3] sm:$0xff] }
  0x14   : > { %v219_v11 = vsel %vm206_vm0, %v217_v5, 0.0  ;;  %232 = vadd.xlane.f32.xlu2 %v231_v10  ;;  %v222_v18 = vsel %vm206_vm0, %v218_v15, 0.0  ;;  %v424_v21 = vld [vmem:[%s521_s20 + $0x4] sm:$0xff]  ;;  %v242_v23 = vmul.f32 %v423_v20, %v200_v7  ;;  %v241_v25 = vmul.f32 %v422_v22, %v199_v0  ;;  %v425_v29 = vld [vmem:[%s521_s20 + $0xc] sm:$0xff] }
  0x15   : > { %v207_v12 = vsel %vm206_vm0, %v204_v6, 0.0  ;;  %220 = vadd.xlane.f32.xlu1 %v219_v11  ;;  %v210_v19 = vsel %vm206_vm0, %v205_v16, 0.0  ;;  %v253_v24 = vmul.f32 %v424_v21, %v199_v0  ;;  %v254_v30 = vmul.f32 %v425_v29, %v200_v7 }
  0x16   : > { %208 = vadd.xlane.f32.xlu0 %v207_v12  ;;  %v246_v26 = vsel %vm206_vm0, %v242_v23, 0.0  ;;  %v243_v28 = vsel %vm206_vm0, %v241_v25, 0.0 }
  0x17   : > { %v255_v27 = vsel %vm206_vm0, %v253_v24, 0.0  ;;  %v258_v31 = vsel %vm206_vm0, %v254_v30, 0.0 }
  0x1c   : > { %235 = vadd.xlane.f32.xlu2 %v234_v17 }
  0x1d   : > { %223 = vadd.xlane.f32.xlu1 %v222_v18 }
  0x1e   : > { %211 = vadd.xlane.f32.xlu0 %v210_v19 }
  0x24   : > { %256 = vadd.xlane.f32.xlu2 %v255_v27 }
  0x25   : > { %247 = vadd.xlane.f32.xlu1 %v246_v26 }
  0x26   : > { %244 = vadd.xlane.f32.xlu0 %v243_v28 }
  0x2e   : > { %259 = vadd.xlane.f32.xlu0 %v258_v31 }
  0x87   : > { %v233_v34 = vpop.xlane.xlu2 %232 }
  0x88   : > { %v221_v32 = vpop.xlane.xlu1 %220  ;;  %v279_v47 = vperm.slane %v233_v34, %v264_v38 }
  0x89   : > { %v209_v33 = vpop.xlane.xlu0 %208  ;;  %v273_v41 = vperm.slane %v221_v32, %v264_v38 }
  0x8a   : > { %v265_v46 = vperm.slane %v209_v33, %v264_v38 }
  0x8f   : > { %v236_v40 = vpop.xlane.xlu2 %235 }
  0x90   : > { %v224_v36 = vpop.xlane.xlu1 %223  ;;  %v280_v48 = vperm.slane %v236_v40, %v266_v39 }
  0x91   : > { %v212_v37 = vpop.xlane.xlu0 %211  ;;  %v274_v42 = vperm.slane %v224_v36, %v266_v39 }
  0x92   : > { %v267_v43 = vperm.slane %v212_v37, %v266_v39  ;;  %v281_v54 = vsel %vm268_vm1, %v280_v48, %v279_v47 }
  0x93   : > { %v275_v49 = vsel %vm268_vm1, %v274_v42, %v273_v41 }
  0x94   : > { %v269_v50 = vsel %vm268_vm1, %v267_v43, %v265_v46 }
  0x95   : > { %v296_v55 = vsel %vm295_vm2, %v269_v50, %v275_v49 }
  0x96   : > { %v298_v60 = vsel %vm297_vm3, %v296_v55, %v281_v54 }
  0x97   : > { %v257_v53 = vpop.xlane.xlu2 %256 }
  0x98   : > { %v248_v45 = vpop.xlane.xlu1 %247  ;;  %v291_v56 = vperm.slane %v257_v53, %v264_v38 }
  0x99   : > { %v245_v44 = vpop.xlane.xlu0 %244  ;;  %v286_v51 = vperm.slane %v248_v45, %v266_v39 }
  0x9a   : > { %v285_v52 = vperm.slane %v245_v44, %v264_v38 }
  0x9c   : > { %v287_v57 = vsel %vm268_vm1, %v286_v51, %v285_v52 }
  0x9d   : > { %v300_v61 = vsel %vm299_vm4, %v298_v60, %v287_v57 }
  0xa1   : > { %v260_v58 = vpop.xlane.xlu0 %259 }
  0xa2   : > { %v292_v59 = vperm.slane %v260_v58, %v266_v39 }
  0xa4   : > { %v293_v62 = vsel %vm268_vm1, %v292_v59, %v291_v56 }
  0xa5   : > { %v302_v63 = vsel %vm301_vm5, %v300_v61, %v293_v62 }
  0xa6   : > { %v303_v0 = vmul.f32 0.03125, %v302_v63 }
  0xa8   : > { %305 = vst.msk [vmem:[%s197_s24] sm:$0x1f] %vm304_vm6, %v303_v0 }
  0xa9 PF: > { %s12_s11 = sadd.s32 1, %s476_s11   ;;  %s564_s9 = smov %s472_s10 }
  0xaa   : > { %p9_p5 = scmp.ge.s32.totalorder %s12_s11, 4   ;;  %s565_s10 = smov %s567_s12 }
  0xac   :  { %11 = sbr.rel (!%p9_p5) target bundleno = 2 (0x2), region = 66 }

</bundles_post_ra>
